<compile_context>
chip_gen: v5e
topology: v5e:2x2
jax: 0.10.0
libtpu: 0.0.40
codegen_flags: <defaults>
</compile_context>

<pallas_src>
import functools

import jax
import jax.numpy as jnp
from jax.experimental import pallas as pl
from jax.experimental.pallas import tpu as pltpu


def _round_up(x: int, m: int) -> int:
    return ((x + m - 1) // m) * m


def _actor_kernel(x_ref, w1_ref, b1_ref, w2_ref, b2_ref, w3_ref, b3_ref,
                  o_ref, *, max_action: float):
    # Layer 1: Linear + ReLU.  State is cast to the layer-1 weight dtype here
    # (in-kernel cast; no wrapper-side HBM pass).  f32 accumulation on the MXU.
    h = jnp.dot(x_ref[...].astype(w1_ref.dtype), w1_ref[...],
                preferred_element_type=jnp.float32)
    h = jnp.maximum(h + b1_ref[...], 0.0)
    # Layer 2: Linear + ReLU  (bf16 matmul on the bf16 path, f32 accumulate).
    h = jnp.dot(h.astype(w2_ref.dtype), w2_ref[...],
                preferred_element_type=jnp.float32)
    h = jnp.maximum(h + b2_ref[...], 0.0)
    # Layer 3: Linear + Tanh, scaled by max_action (tanh runs on the EUP, f32).
    h = jnp.dot(h.astype(w3_ref.dtype), w3_ref[...],
                preferred_element_type=jnp.float32)
    o_ref[...] = (max_action * jnp.tanh(h + b3_ref[...])).astype(o_ref.dtype)


def prepare_actor_params(params, *, use_bf16: bool = True,
                         keep_layer1_f32: bool = True,
                         lane_dense_output: bool = True):
    """One-time pad + cast of the (transposed) Actor weights.

    Do this once at init / load time; the result is passed to actor_forward so
    no per-call pad/cast XLA passes are paid on the hot path.
    """
    w1, b1, w2, b2, w3, b3 = (params["w1"], params["b1"], params["w2"],
                              params["b2"], params["w3"], params["b3"])
    state_dim, hidden = w1.shape
    action_dim = w3.shape[1]

    sd_pad = _round_up(state_dim, 8)                       # sublane-align K of layer 1
    ad_pad = _round_up(action_dim, 128) if lane_dense_output else action_dim

    mm_dtype = jnp.bfloat16 if use_bf16 else jnp.float32   # layers 2/3 matmul dtype
    l1_dtype = jnp.float32 if (keep_layer1_f32 or not use_bf16) else jnp.bfloat16

    w1_p = jnp.pad(w1, ((0, sd_pad - state_dim), (0, 0))).astype(l1_dtype)
    w2_p = w2.astype(mm_dtype)
    w3_p = jnp.pad(w3, ((0, 0), (0, ad_pad - action_dim))).astype(mm_dtype)
    b1_p = b1.reshape(1, hidden).astype(jnp.float32)
    b2_p = b2.reshape(1, hidden).astype(jnp.float32)
    b3_p = jnp.pad(b3.reshape(1, action_dim),
                   ((0, 0), (0, ad_pad - action_dim))).astype(jnp.float32)

    return {
        "w1": w1_p, "b1": b1_p, "w2": w2_p, "b2": b2_p, "w3": w3_p, "b3": b3_p,
        "state_dim": int(state_dim), "action_dim": int(action_dim),
    }


def actor_forward(state, prepared, max_action: float, *,
                  batch_tile: int = 1024, min_blocks: int = 1):
    """state: (B, state_dim) float32; prepared: output of prepare_actor_params.

    Returns (B, action_dim) float32 actions in [-max_action, max_action].
    Set min_blocks=2 on v7x so the parallel batch grid feeds both TensorCores.
    """
    w1, b1, w2, b2, w3, b3 = (prepared["w1"], prepared["b1"], prepared["w2"],
                              prepared["b2"], prepared["w3"], prepared["b3"])
    B, state_dim = state.shape
    assert state_dim == prepared["state_dim"]
    sd_pad, hidden = w1.shape
    ad_pad = w3.shape[1]
    action_dim = prepared["action_dim"]

    if state.dtype != jnp.float32:
        state = state.astype(jnp.float32)

    # --- batch tile selection: fewest grid steps (v5e/v6e), or >=min_blocks (v7x) ---
    bt = min(_round_up(batch_tile, 8), _round_up(B, 8))
    if min_blocks > 1:
        bt = min(bt, max(8, _round_up(pl.cdiv(B, min_blocks), 8)))
    b_pad = _round_up(B, bt)

    # Pad the batch (and K sublanes) only when actually required; no dtype cast here.
    if (b_pad != B) or (sd_pad != state_dim):
        x_p = jnp.pad(state, ((0, b_pad - B), (0, sd_pad - state_dim)))
    else:
        x_p = state

    grid = (b_pad // bt,)
    kernel = functools.partial(_actor_kernel, max_action=float(max_action))

    out_padded = pl.pallas_call(
        kernel,
        out_shape=jax.ShapeDtypeStruct((b_pad, ad_pad), jnp.float32),
        grid_spec=pltpu.PrefetchScalarGridSpec(
            num_scalar_prefetch=0,
            grid=grid,
            in_specs=[
                # state tile: iterate over batch
                pl.BlockSpec((bt, sd_pad), lambda i: (i, 0)),
                # weights / biases: full blocks, resident across the grid
                pl.BlockSpec((sd_pad, hidden), lambda i: (0, 0)),
                pl.BlockSpec((1, hidden), lambda i: (0, 0)),
                pl.BlockSpec((hidden, hidden), lambda i: (0, 0)),
                pl.BlockSpec((1, hidden), lambda i: (0, 0)),
                pl.BlockSpec((hidden, ad_pad), lambda i: (0, 0)),
                pl.BlockSpec((1, ad_pad), lambda i: (0, 0)),
            ],
            out_specs=pl.BlockSpec((bt, ad_pad), lambda i: (i, 0)),
        ),
        compiler_params=pltpu.CompilerParams(
            dimension_semantics=("parallel",)),
    )(x_p, w1, b1, w2, b2, w3, b3)

    if (b_pad != B) or (ad_pad != action_dim):
        return out_padded[:B, :action_dim]
    return out_padded


def init_actor_params(key, state_dim: int, action_dim: int, hidden: int = 256):
    """Deterministic init mimicking torch.nn.Linear default (U[-1/sqrt(fan_in), 1/sqrt(fan_in)]).
    Weights are stored transposed: (in_features, out_features)."""
    keys = jax.random.split(key, 6)

    def lin(kw, kb, fan_in, fan_out):
        bound = 1.0 / jnp.sqrt(fan_in)
        w = jax.random.uniform(kw, (fan_in, fan_out), jnp.float32, -bound, bound)
        b = jax.random.uniform(kb, (1, fan_out), jnp.float32, -bound, bound)
        return w, b

    w1, b1 = lin(keys[0], keys[1], state_dim, hidden)
    w2, b2 = lin(keys[2], keys[3], hidden, hidden)
    w3, b3 = lin(keys[4], keys[5], hidden, action_dim)
    return {"w1": w1, "b1": b1, "w2": w2, "b2": b2, "w3": w3, "b3": b3}


def actor_reference(state, params, max_action: float):
    """Pure-JAX (f32) reference of the PyTorch forward."""
    h = jnp.maximum(state @ params["w1"] + params["b1"], 0.0)
    h = jnp.maximum(h @ params["w2"] + params["b2"], 0.0)
    return max_action * jnp.tanh(h @ params["w3"] + params["b3"])


if __name__ == "__main__":
    key = jax.random.PRNGKey(0)
    k_params, k_state1, k_state2 = jax.random.split(key, 3)

    state_dim = 32
    action_dim = 8
    max_action = 1.0
    params = init_actor_params(k_params, state_dim, action_dim)

    # One-time weight prep (padding + dtype cast hoisted out of the hot path).
    prep_f32 = prepare_actor_params(params, use_bf16=False)
    prep_bf16 = prepare_actor_params(params, use_bf16=True)

    # --- small batch, exact f32 path (tight tolerance) ---
    state_small = jax.random.normal(k_state1, (8, state_dim), jnp.float32)
    out_f32 = actor_forward(state_small, prep_f32, max_action)
    out_f32 = jax.block_until_ready(out_f32)
    ref_small = actor_reference(state_small, params, max_action)
    assert out_f32.shape == (8, action_dim)
    assert jnp.allclose(out_f32, ref_small, atol=1e-5, rtol=1e-5), \
        "f32 path mismatch vs reference"

    # --- larger batch, bf16 path, single-tile grid (fewest steps: v5e/v6e style) ---
    state_big = jax.random.normal(k_state2, (512, state_dim), jnp.float32)
    out_bf16 = actor_forward(state_big, prep_bf16, max_action)
    out_bf16 = jax.block_until_ready(out_bf16)
    ref_big = actor_reference(state_big, params, max_action)
    assert out_bf16.shape == (512, action_dim)
    assert jnp.allclose(out_bf16, ref_big, atol=2e-2, rtol=2e-2), \
        "bf16 path mismatch vs reference"

    # --- same batch, bf16 path split into 2 parallel blocks (v7x megacore style) ---
    out_bf16_mc = actor_forward(state_big, prep_bf16, max_action, min_blocks=2)
    out_bf16_mc = jax.block_until_ready(out_bf16_mc)
    assert out_bf16_mc.shape == (512, action_dim)
    assert jnp.allclose(out_bf16_mc, ref_big, atol=2e-2, rtol=2e-2), \
        "bf16 2-block path mismatch vs reference"

    print("KERNEL_OK")
</pallas_src>

<mosaic_0001>
module attributes {stable_mosaic.version = 11 : i64} {
  func.func @_actor_kernel(%arg0: i32, %arg1: memref<8x32xf32, #tpu.memory_space<vmem>>, %arg2: memref<32x256xf32, #tpu.memory_space<vmem>>, %arg3: memref<1x256xf32, #tpu.memory_space<vmem>>, %arg4: memref<256x256xf32, #tpu.memory_space<vmem>>, %arg5: memref<1x256xf32, #tpu.memory_space<vmem>>, %arg6: memref<256x128xf32, #tpu.memory_space<vmem>>, %arg7: memref<1x128xf32, #tpu.memory_space<vmem>>, %arg8: memref<8x128xf32, #tpu.memory_space<vmem>>) attributes {dimension_semantics = [#tpu.dimension_semantics<parallel>], iteration_bounds = array<i64: 1>, scalar_prefetch = 0 : i64, scratch_operands = 0 : i64, tpu.core_type = #tpu.core_type<tc>, window_params = [{transform_indices = @transform_0, window_bounds = array<i64: 8, 32>}, {pipeline_mode = #tpu.pipeline_mode<synchronous>, transform_indices = @transform_1, window_bounds = array<i64: 32, 256>}, {pipeline_mode = #tpu.pipeline_mode<synchronous>, transform_indices = @transform_2, window_bounds = array<i64: 1, 256>}, {pipeline_mode = #tpu.pipeline_mode<synchronous>, transform_indices = @transform_3, window_bounds = array<i64: 256, 256>}, {pipeline_mode = #tpu.pipeline_mode<synchronous>, transform_indices = @transform_4, window_bounds = array<i64: 1, 256>}, {pipeline_mode = #tpu.pipeline_mode<synchronous>, transform_indices = @transform_5, window_bounds = array<i64: 256, 128>}, {pipeline_mode = #tpu.pipeline_mode<synchronous>, transform_indices = @transform_6, window_bounds = array<i64: 1, 128>}, {transform_indices = @transform_7, window_bounds = array<i64: 8, 128>}]} {
    %c0 = arith.constant 0 : index
    %c0_0 = arith.constant 0 : index
    %0 = vector.load %arg1[%c0, %c0_0] : memref<8x32xf32, #tpu.memory_space<vmem>>, vector<8x32xf32>
    %c0_1 = arith.constant 0 : index
    %c0_2 = arith.constant 0 : index
    %1 = vector.load %arg2[%c0_1, %c0_2] : memref<32x256xf32, #tpu.memory_space<vmem>>, vector<32x256xf32>
    %cst = arith.constant dense<0.000000e+00> : vector<8x256xf32>
    %2 = tpu.matmul %0, %1, %cst {dimension_numbers = #tpu.dot_dimension_numbers<[1], [0], [0], [1], [0, 0, 1, 1], [], []>} : vector<8x32xf32>, vector<32x256xf32>, vector<8x256xf32> -> vector<8x256xf32>
    %c0_3 = arith.constant 0 : index
    %c0_4 = arith.constant 0 : index
    %3 = vector.load %arg3[%c0_3, %c0_4] : memref<1x256xf32, #tpu.memory_space<vmem>>, vector<1x256xf32>
    %4 = vector.broadcast %3 : vector<1x256xf32> to vector<8x256xf32>
    %5 = arith.addf %2, %4 : vector<8x256xf32>
    %cst_5 = arith.constant 0.000000e+00 : f32
    %6 = vector.broadcast %cst_5 : f32 to vector<8x256xf32>
    %7 = arith.maximumf %5, %6 : vector<8x256xf32>
    %c0_6 = arith.constant 0 : index
    %c0_7 = arith.constant 0 : index
    %8 = vector.load %arg4[%c0_6, %c0_7] : memref<256x256xf32, #tpu.memory_space<vmem>>, vector<256x256xf32>
    %cst_8 = arith.constant dense<0.000000e+00> : vector<8x256xf32>
    %9 = tpu.matmul %7, %8, %cst_8 {dimension_numbers = #tpu.dot_dimension_numbers<[1], [0], [0], [1], [0, 0, 1, 1], [], []>} : vector<8x256xf32>, vector<256x256xf32>, vector<8x256xf32> -> vector<8x256xf32>
    %c0_9 = arith.constant 0 : index
    %c0_10 = arith.constant 0 : index
    %10 = vector.load %arg5[%c0_9, %c0_10] : memref<1x256xf32, #tpu.memory_space<vmem>>, vector<1x256xf32>
    %11 = vector.broadcast %10 : vector<1x256xf32> to vector<8x256xf32>
    %12 = arith.addf %9, %11 : vector<8x256xf32>
    %cst_11 = arith.constant 0.000000e+00 : f32
    %13 = vector.broadcast %cst_11 : f32 to vector<8x256xf32>
    %14 = arith.maximumf %12, %13 : vector<8x256xf32>
    %c0_12 = arith.constant 0 : index
    %c0_13 = arith.constant 0 : index
    %15 = vector.load %arg6[%c0_12, %c0_13] : memref<256x128xf32, #tpu.memory_space<vmem>>, vector<256x128xf32>
    %cst_14 = arith.constant dense<0.000000e+00> : vector<8x128xf32>
    %16 = tpu.matmul %14, %15, %cst_14 {dimension_numbers = #tpu.dot_dimension_numbers<[1], [0], [0], [1], [0, 0, 1, 1], [], []>} : vector<8x256xf32>, vector<256x128xf32>, vector<8x128xf32> -> vector<8x128xf32>
    %c0_15 = arith.constant 0 : index
    %c0_16 = arith.constant 0 : index
    %17 = vector.load %arg7[%c0_15, %c0_16] : memref<1x128xf32, #tpu.memory_space<vmem>>, vector<1x128xf32>
    %18 = vector.broadcast %17 : vector<1x128xf32> to vector<8x128xf32>
    %19 = arith.addf %16, %18 : vector<8x128xf32>
    %20 = math.tanh %19 : vector<8x128xf32>
    %cst_17 = arith.constant 1.000000e+00 : f32
    %21 = vector.broadcast %cst_17 : f32 to vector<8x128xf32>
    %22 = arith.mulf %21, %20 : vector<8x128xf32>
    %c0_18 = arith.constant 0 : index
    %c0_19 = arith.constant 0 : index
    %23 = vector.load %arg8[%c0_18, %c0_19] : memref<8x128xf32, #tpu.memory_space<vmem>>, vector<8x128xf32>
    tpu.vector_store %arg8[%c0_18, %c0_19], %22 {strides = array<i32>} : memref<8x128xf32, #tpu.memory_space<vmem>>, vector<8x128xf32>,
    return
  }
  func.func @transform_0(%arg0: i32) -> (i32, i32) {
    %c0_i32 = arith.constant 0 : i32
    %c0_i32_0 = arith.constant 0 : i32
    return %arg0, %c0_i32 : i32, i32
  }
  func.func @transform_1(%arg0: i32) -> (i32, i32) {
    %c0_i32 = arith.constant 0 : i32
    %c0_i32_0 = arith.constant 0 : i32
    %c0_i32_1 = arith.constant 0 : i32
    return %c0_i32, %c0_i32_0 : i32, i32
  }
  func.func @transform_2(%arg0: i32) -> (i32, i32) {
    %c0_i32 = arith.constant 0 : i32
    %c0_i32_0 = arith.constant 0 : i32
    %c0_i32_1 = arith.constant 0 : i32
    return %c0_i32, %c0_i32_0 : i32, i32
  }
  func.func @transform_3(%arg0: i32) -> (i32, i32) {
    %c0_i32 = arith.constant 0 : i32
    %c0_i32_0 = arith.constant 0 : i32
    %c0_i32_1 = arith.constant 0 : i32
    return %c0_i32, %c0_i32_0 : i32, i32
  }
  func.func @transform_4(%arg0: i32) -> (i32, i32) {
    %c0_i32 = arith.constant 0 : i32
    %c0_i32_0 = arith.constant 0 : i32
    %c0_i32_1 = arith.constant 0 : i32
    return %c0_i32, %c0_i32_0 : i32, i32
  }
  func.func @transform_5(%arg0: i32) -> (i32, i32) {
    %c0_i32 = arith.constant 0 : i32
    %c0_i32_0 = arith.constant 0 : i32
    %c0_i32_1 = arith.constant 0 : i32
    return %c0_i32, %c0_i32_0 : i32, i32
  }
  func.func @transform_6(%arg0: i32) -> (i32, i32) {
    %c0_i32 = arith.constant 0 : i32
    %c0_i32_0 = arith.constant 0 : i32
    %c0_i32_1 = arith.constant 0 : i32
    return %c0_i32, %c0_i32_0 : i32, i32
  }
  func.func @transform_7(%arg0: i32) -> (i32, i32) {
    %c0_i32 = arith.constant 0 : i32
    %c0_i32_0 = arith.constant 0 : i32
    return %arg0, %c0_i32 : i32, i32
  }
}

</mosaic_0001>

<bundles_post_ra>
// kernel: tpu_custom_call.1
= control target key start
LH: loop header
LB: loop body
LE: loop exit
PB: predicated region body
PF: predicated region fallthrough
CT: control target
= control target key end

     0   :  { %12 = vsyncpa [#allocation3], 0  ;;  %s652_s0 = inlined_call_operand.hbm [shape: f32[8,32], index: 0, kind: input, shape index: {}]   ;;  %s653_s1 = inlined_call_operand.hbm [shape: f32[32,256], index: 1, kind: input, shape index: {}]   ;;  %s654_s2 = inlined_call_operand.hbm [shape: f32[1,256], index: 2, kind: input, shape index: {}]   ;;  %s655_s3 = inlined_call_operand.hbm [shape: f32[256,256], index: 3, kind: input, shape index: {}]   ;;  %s656_s4 = inlined_call_operand.vmem [shape: f32[1,256], index: 4, kind: input, shape index: {}]   ;;  %s657_s5 = inlined_call_operand.hbm [shape: f32[256,128], index: 5, kind: input, shape index: {}]   ;;  %s658_s6 = inlined_call_operand.vmem [shape: f32[1,128], index: 6, kind: input, shape index: {}]   ;;  %s659_s7 = inlined_call_operand.hbm [shape: f32[8,128], index: 7, kind: output, shape index: {}]  }
   0x1   :  { %13 = vsyncpa [#allocation6], 0 }
   0x2   :  { %14 = vsyncpa [#allocation9], 0  ;;  %s31_s26 = sshll.u32 %s653_s1, 4  ;;  %s32_s26 = int_to_ptr.hbm [resolvable:$true] %s31_s26 }
   0x3   :  { %15 = vsyncpa [#allocation4], 0  ;;  %s578_s27 = smov [#allocation5]   ;;  %s55_s8 = sshll.u32 %s655_s3, 4  ;;  %s56_s8 = int_to_ptr.hbm [resolvable:$true] %s55_s8 }
   0x4   :  { %s33_s28 = sshll.u32 %s578_s27, 4  ;;  %s579_s9 = smov 256   ;;  %s34_s28 = int_to_ptr.vmem [resolvable:$true] %s33_s28 }
   0x5   :  { %s580_s10 = smov 16   ;;  %s581_s11 = smov [#allocation8]  }
   0x6   :  { %39 = dma.hbm_to_vmem [thread:$0]  %s32_s26, 1024, %s34_s28, [#allocation6], %s579_s9, %s579_s9, %s580_s10  }
   0x7   :  { %s57_s12 = sshll.u32 %s581_s11, 4  ;;  %s21_s15 = sshll.u32 %s652_s0, 4  ;;  %s58_s12 = int_to_ptr.vmem [resolvable:$true] %s57_s12  ;;  %s22_s15 = int_to_ptr.hbm [resolvable:$true] %s21_s15 }
   0x8   :  { %63 = dma.hbm_to_vmem [thread:$0]  %s56_s8, 8192, %s58_s12, [#allocation9], %s579_s9, %s579_s9, %s580_s10  }
   0x9   :  { %s45_s17 = sshll.u32 %s654_s2, 4  ;;  %s582_s18 = smov [#allocation2]   ;;  %s46_s17 = int_to_ptr.hbm [resolvable:$true] %s45_s17 }
   0xa   :  { %s23_s19 = sshll.u32 %s582_s18, 4  ;;  %s583_s3 = smov [#allocation7]   ;;  %s24_s19 = int_to_ptr.vmem [resolvable:$true] %s23_s19 }
   0xb   :  { %26 = dma.hbm_to_vmem [thread:$0]  %s22_s15, 128, %s24_s19, [#allocation3]  }
   0xc   :  { %s47_s20 = sshll.u32 %s583_s3, 4  ;;  %s70_s23 = sshll.u32 %s657_s5, 4  ;;  %s48_s20 = int_to_ptr.vmem [resolvable:$true] %s47_s20  ;;  %s71_s23 = int_to_ptr.hbm [resolvable:$true] %s70_s23 }
   0xd   :  { %50 = dma.hbm_to_vmem [thread:$0]  %s46_s17, 32, %s48_s20, [#allocation6]  }
   0xe   :  { %s584_s0 = smov [#allocation10]   ;;  %s585_s25 = smov 128  }
   0xf   :  { %s72_s24 = sshll.u32 %s584_s0, 4  ;;  %s586_s26 = smov 8   ;;  %s73_s24 = int_to_ptr.vmem [resolvable:$true] %s72_s24 }
  0x10   :  { %78 = dma.hbm_to_vmem [thread:$0]  %s71_s23, 4096, %s73_s24, [#allocation9], %s585_s25, %s585_s25, %s586_s26  }
  0x11   :  { %570 = dma.done.wait [#allocation3], 128  }
  0x12   :  { %571 = vsyncadd [#allocation3], 4294967168 }
  0x13   :  { %572 = dma.done.wait [#allocation6], 1056  }
  0x14   :  { %573 = vsyncadd [#allocation6], 4294966240 }
  0x15   :  { %574 = dma.done.wait [#allocation9], 12288  }
  0x16   :  { %575 = vsyncadd [#allocation9], 4294955008  ;;  %v108_v0 = vld [vmem:[#allocation5 + $0x30] sm:$0xff]  ;;  %v106_v1 = vld [vmem:[#allocation5 + $0x20] sm:$0xff]  ;;  %vm116_vm0 = vcmask 261120   ;;  %s399_s9 = sshll.u32 %s659_s7, 4  ;;  %s400_s9 = int_to_ptr.hbm [resolvable:$true] %s399_s9 }
  0x17   :  { %v109_v2 = vld [vmem:[#allocation5 + $0x38] sm:$0xff]  ;;  %132 = vmatpush.msra.mxu0 %v108_v0  ;;  %v107_v3 = vld [vmem:[#allocation5 + $0x28] sm:$0xff]  ;;  %v104_v4 = vld [vmem:[#allocation5 + $0x10] sm:$0xff] }
  0x18   :  { %152 = vmatpush.msra.mxu1 %v109_v2  ;;  %v105_v5 = vld [vmem:[#allocation5 + $0x18] sm:$0xff]  ;;  %v190_v7 = vld [vmem:[#allocation8 + $0xe0] sm:$0xff]  ;;  %v191_v16 = vld [vmem:[#allocation8 + $0xe8] sm:$0xff] }
  0x19   :  { %133 = vmatpush.msra.mxu0 %v106_v1  ;;  %v192_v6 = vld [vmem:[#allocation8 + $0xf0] sm:$0xff]  ;;  %v102_v8 = vld [vmem:[#allocation5] sm:$0xff]  ;;  %v103_v9 = vld [vmem:[#allocation5 + $0x8] sm:$0xff] }
  0x1a   :  { %153 = vmatpush.msra.mxu1 %v107_v3  ;;  %232 = vmatpush.msra.mxu2 %v192_v6  ;;  %v224_v10 = vld [vmem:[#allocation8 + $0x1f0] sm:$0xff]  ;;  %v193_v12 = vld [vmem:[#allocation8 + $0xf8] sm:$0xff]  ;;  %v222_v15 = vld [vmem:[#allocation8 + $0x1e0] sm:$0xff] }
  0x1b   :  { %134 = vmatpush.msra.mxu0 %v104_v4  ;;  %v101_v11 = vld [vmem:[#allocation2] sm:$0xff]  ;;  %252 = vmatpush.msra.mxu3 %v224_v10  ;;  %v223_v17 = vld [vmem:[#allocation8 + $0x1e8] sm:$0xff]  ;;  %v186_v18 = vld [vmem:[#allocation8 + $0xc0] sm:$0xff] }
  0x1c   :  { %154 = vmatpush.msra.mxu1 %v105_v5  ;;  %233 = vmatpush.msra.mxu2 %v190_v7  ;;  %v225_v13 = vld [vmem:[#allocation8 + $0x1f8] sm:$0xff]  ;;  %v188_v14 = vld [vmem:[#allocation8 + $0xd0] sm:$0xff]  ;;  %v218_v23 = vld [vmem:[#allocation8 + $0x1c0] sm:$0xff] }
  0x1d   :  { %135 = vmatpush.msra.mxu0 %v102_v8  ;;  %v220_v19 = vld [vmem:[#allocation8 + $0x1d0] sm:$0xff]  ;;  %253 = vmatpush.msra.mxu3 %v222_v15  ;;  %v189_v20 = vld [vmem:[#allocation8 + $0xd8] sm:$0xff]  ;;  %v187_v24 = vld [vmem:[#allocation8 + $0xc8] sm:$0xff] }
  0x1e   :  { %155 = vmatpush.msra.mxu1 %v103_v9  ;;  %411 = vmatmul.msk.f32.vlgmr.msra.gmra.mxu0 %vm116_vm0, %v101_v11  ;;  %v221_v21 = vld [vmem:[#allocation8 + $0x1d8] sm:$0xff]  ;;  %v184_v22 = vld [vmem:[#allocation8 + $0xb0] sm:$0xff]  ;;  %v219_v25 = vld [vmem:[#allocation8 + $0x1c8] sm:$0xff] }
  0x1f   :  { %412 = vmatmul.msk.f32.vlgmr.msra.gmra.mxu1 %vm116_vm0, %v101_v11  ;;  %272 = vmatpush.msrb.mxu0 %v193_v12  ;;  %v182_v26 = vld [vmem:[#allocation8 + $0xa0] sm:$0xff]  ;;  %v216_v27 = vld [vmem:[#allocation8 + $0x1b0] sm:$0xff]  ;;  %v185_v28 = vld [vmem:[#allocation8 + $0xb8] sm:$0xff] }
  0x20   :  { %292 = vmatpush.msrb.mxu1 %v225_v13  ;;  %234 = vmatpush.msra.mxu2 %v188_v14  ;;  %v217_v29 = vld [vmem:[#allocation8 + $0x1b8] sm:$0xff]  ;;  %v180_v30 = vld [vmem:[#allocation8 + $0x90] sm:$0xff]  ;;  %v214_v31 = vld [vmem:[#allocation8 + $0x1a0] sm:$0xff] }
  0x21   :  { %273 = vmatpush.msrb.mxu0 %v191_v16  ;;  %254 = vmatpush.msra.mxu3 %v220_v19  ;;  %v183_v32 = vld [vmem:[#allocation8 + $0xa8] sm:$0xff]  ;;  %v178_v34 = vld [vmem:[#allocation8 + $0x80] sm:$0xff]  ;;  %v212_v35 = vld [vmem:[#allocation8 + $0x190] sm:$0xff] }
  0x22   :  { %293 = vmatpush.msrb.mxu1 %v223_v17  ;;  %235 = vmatpush.msra.mxu2 %v186_v18  ;;  %v215_v33 = vld [vmem:[#allocation8 + $0x1a8] sm:$0xff]  ;;  %v181_v36 = vld [vmem:[#allocation8 + $0x98] sm:$0xff]  ;;  %v176_v38 = vld [vmem:[#allocation8 + $0x70] sm:$0xff] }
  0x23   :  { %274 = vmatpush.msrb.mxu0 %v189_v20  ;;  %255 = vmatpush.msra.mxu3 %v218_v23  ;;  %v213_v37 = vld [vmem:[#allocation8 + $0x198] sm:$0xff]  ;;  %v210_v39 = vld [vmem:[#allocation8 + $0x180] sm:$0xff]  ;;  %v179_v40 = vld [vmem:[#allocation8 + $0x88] sm:$0xff] }
  0x24   :  { %294 = vmatpush.msrb.mxu1 %v221_v21  ;;  %236 = vmatpush.msra.mxu2 %v184_v22  ;;  %v211_v41 = vld [vmem:[#allocation8 + $0x188] sm:$0xff]  ;;  %v174_v42 = vld [vmem:[#allocation8 + $0x60] sm:$0xff]  ;;  %v208_v43 = vld [vmem:[#allocation8 + $0x170] sm:$0xff] }
  0x25   :  { %275 = vmatpush.msrb.mxu0 %v187_v24  ;;  %256 = vmatpush.msra.mxu3 %v216_v27  ;;  %v177_v44 = vld [vmem:[#allocation8 + $0x78] sm:$0xff]  ;;  %v172_v46 = vld [vmem:[#allocation8 + $0x50] sm:$0xff]  ;;  %v206_v47 = vld [vmem:[#allocation8 + $0x160] sm:$0xff] }
  0x26   :  { %295 = vmatpush.msrb.mxu1 %v219_v25  ;;  %237 = vmatpush.msra.mxu2 %v182_v26  ;;  %v209_v45 = vld [vmem:[#allocation8 + $0x178] sm:$0xff]  ;;  %v175_v48 = vld [vmem:[#allocation8 + $0x68] sm:$0xff]  ;;  %v170_v50 = vld [vmem:[#allocation8 + $0x40] sm:$0xff] }
  0x27   :  { %276 = vmatpush.msrb.mxu0 %v185_v28  ;;  %257 = vmatpush.msra.mxu3 %v214_v31  ;;  %v207_v49 = vld [vmem:[#allocation8 + $0x168] sm:$0xff]  ;;  %v204_v51 = vld [vmem:[#allocation8 + $0x150] sm:$0xff]  ;;  %v173_v52 = vld [vmem:[#allocation8 + $0x58] sm:$0xff] }
  0x28   :  { %296 = vmatpush.msrb.mxu1 %v217_v29  ;;  %238 = vmatpush.msra.mxu2 %v180_v30  ;;  %v205_v53 = vld [vmem:[#allocation8 + $0x158] sm:$0xff]  ;;  %v168_v54 = vld [vmem:[#allocation8 + $0x30] sm:$0xff]  ;;  %v202_v55 = vld [vmem:[#allocation8 + $0x140] sm:$0xff] }
  0x29   :  { %277 = vmatpush.msrb.mxu0 %v183_v32  ;;  %258 = vmatpush.msra.mxu3 %v212_v35  ;;  %v171_v56 = vld [vmem:[#allocation8 + $0x48] sm:$0xff]  ;;  %v169_v58 = vld [vmem:[#allocation8 + $0x38] sm:$0xff]  ;;  %v166_v59 = vld [vmem:[#allocation8 + $0x20] sm:$0xff] }
  0x2a   :  { %297 = vmatpush.msrb.mxu1 %v215_v33  ;;  %239 = vmatpush.msra.mxu2 %v178_v34  ;;  %v203_v57 = vld [vmem:[#allocation8 + $0x148] sm:$0xff]  ;;  %v200_v60 = vld [vmem:[#allocation8 + $0x130] sm:$0xff]  ;;  %v201_v62 = vld [vmem:[#allocation8 + $0x138] sm:$0xff] }
  0x2b   :  { %278 = vmatpush.msrb.mxu0 %v181_v36  ;;  %259 = vmatpush.msra.mxu3 %v210_v39  ;;  %v167_v61 = vld [vmem:[#allocation8 + $0x28] sm:$0xff]  ;;  %v164_v63 = vld [vmem:[#allocation8 + $0x10] sm:$0xff]  ;;  %v198_v0 = vld [vmem:[#allocation8 + $0x120] sm:$0xff] }
  0x2c   :  { %298 = vmatpush.msrb.mxu1 %v213_v37  ;;  %240 = vmatpush.msra.mxu2 %v176_v38  ;;  %v165_v1 = vld [vmem:[#allocation8 + $0x18] sm:$0xff]  ;;  %v199_v2 = vld [vmem:[#allocation8 + $0x128] sm:$0xff]  ;;  %v162_v3 = vld [vmem:[#allocation8] sm:$0xff] }
  0x2d   :  { %279 = vmatpush.msrb.mxu0 %v179_v40  ;;  %260 = vmatpush.msra.mxu3 %v208_v43  ;;  %v196_v4 = vld [vmem:[#allocation8 + $0x110] sm:$0xff]  ;;  %v163_v5 = vld [vmem:[#allocation8 + $0x8] sm:$0xff]  ;;  %v197_v6 = vld [vmem:[#allocation8 + $0x118] sm:$0xff] }
  0x2e   :  { %299 = vmatpush.msrb.mxu1 %v211_v41  ;;  %241 = vmatpush.msra.mxu2 %v174_v42  ;;  %v194_v7 = vld [vmem:[#allocation8 + $0x100] sm:$0xff]  ;;  %v195_v8 = vld [vmem:[#allocation8 + $0x108] sm:$0xff]  ;;  %v345_v9 = vld [vmem:[#allocation10 + $0xf8] sm:$0xff] }
  0x2f   :  { %280 = vmatpush.msrb.mxu0 %v177_v44  ;;  %261 = vmatpush.msra.mxu3 %v206_v47  ;;  %v344_v10 = vld [vmem:[#allocation10 + $0xf0] sm:$0xff]  ;;  %v329_v11 = vld [vmem:[#allocation10 + $0x78] sm:$0xff]  ;;  %v343_v13 = vld [vmem:[#allocation10 + $0xe8] sm:$0xff] }
  0x30   :  { %300 = vmatpush.msrb.mxu1 %v209_v45  ;;  %242 = vmatpush.msra.mxu2 %v172_v46  ;;  %v328_v12 = vld [vmem:[#allocation10 + $0x70] sm:$0xff]  ;;  %v327_v14 = vld [vmem:[#allocation10 + $0x68] sm:$0xff]  ;;  %v342_v15 = vld [vmem:[#allocation10 + $0xe0] sm:$0xff] }
  0x31   :  { %281 = vmatpush.msrb.mxu0 %v175_v48  ;;  %262 = vmatpush.msra.mxu3 %v204_v51  ;;  %v326_v16 = vld [vmem:[#allocation10 + $0x60] sm:$0xff]  ;;  %v341_v17 = vld [vmem:[#allocation10 + $0xd8] sm:$0xff]  ;;  %v340_v19 = vld [vmem:[#allocation10 + $0xd0] sm:$0xff] }
  0x32   :  { %301 = vmatpush.msrb.mxu1 %v207_v49  ;;  %243 = vmatpush.msra.mxu2 %v170_v50  ;;  %v325_v18 = vld [vmem:[#allocation10 + $0x58] sm:$0xff]  ;;  %v324_v20 = vld [vmem:[#allocation10 + $0x50] sm:$0xff]  ;;  %v339_v21 = vld [vmem:[#allocation10 + $0xc8] sm:$0xff] }
  0x33   :  { %282 = vmatpush.msrb.mxu0 %v173_v52  ;;  %263 = vmatpush.msra.mxu3 %v202_v55  ;;  %v323_v22 = vld [vmem:[#allocation10 + $0x48] sm:$0xff]  ;;  %v338_v23 = vld [vmem:[#allocation10 + $0xc0] sm:$0xff]  ;;  %v337_v25 = vld [vmem:[#allocation10 + $0xb8] sm:$0xff] }
  0x34   :  { %302 = vmatpush.msrb.mxu1 %v205_v53  ;;  %244 = vmatpush.msra.mxu2 %v168_v54  ;;  %v322_v24 = vld [vmem:[#allocation10 + $0x40] sm:$0xff]  ;;  %v321_v26 = vld [vmem:[#allocation10 + $0x38] sm:$0xff]  ;;  %v336_v27 = vld [vmem:[#allocation10 + $0xb0] sm:$0xff] }
  0x35   :  { %283 = vmatpush.msrb.mxu0 %v171_v56  ;;  %264 = vmatpush.msra.mxu3 %v200_v60  ;;  %v335_v28 = vld [vmem:[#allocation10 + $0xa8] sm:$0xff]  ;;  %v110_v29 = vld [vmem:[#allocation7] sm:$0x3]  ;;  %v334_v30 = vld [vmem:[#allocation10 + $0xa0] sm:$0xff] }
  0x36   :  { %303 = vmatpush.msrb.mxu1 %v203_v57  ;;  %245 = vmatpush.msra.mxu2 %v166_v59  ;;  %v112_v31 = vperm.slane %v110_v29, 0  ;;  %v113_v32 = vperm.slane %v110_v29, 1  ;;  %v320_v39 = vld [vmem:[#allocation10 + $0x30] sm:$0xff]  ;;  %v333_v40 = vld [vmem:[#allocation10 + $0x98] sm:$0xff]  ;;  %v319_v41 = vld [vmem:[#allocation10 + $0x28] sm:$0xff] }
  0x37   :  { %284 = vmatpush.msrb.mxu0 %v169_v58  ;;  %265 = vmatpush.msra.mxu3 %v198_v0  ;;  %v332_v42 = vld [vmem:[#allocation10 + $0x90] sm:$0xff]  ;;  %v318_v43 = vld [vmem:[#allocation10 + $0x20] sm:$0xff]  ;;  %v331_v44 = vld [vmem:[#allocation10 + $0x88] sm:$0xff] }
  0x38   :  { %304 = vmatpush.msrb.mxu1 %v201_v62  ;;  %246 = vmatpush.msra.mxu2 %v164_v63  ;;  %v317_v45 = vld [vmem:[#allocation10 + $0x18] sm:$0xff]  ;;  %v330_v46 = vld [vmem:[#allocation10 + $0x80] sm:$0xff]  ;;  %v316_v47 = vld [vmem:[#allocation10 + $0x10] sm:$0xff] }
  0x39   :  { %285 = vmatpush.msrb.mxu0 %v167_v61  ;;  %266 = vmatpush.msra.mxu3 %v196_v4  ;;  %v315_v48 = vld [vmem:[#allocation10 + $0x8] sm:$0xff]  ;;  %v314_v49 = vld [vmem:[#allocation10] sm:$0xff]  ;;  %v226_v50 = vld [vmem:[%s656_s4] sm:$0x3]  ;;  %s587_s4 = smov [#allocation11]  }
  0x3a   :  { %305 = vmatpush.msrb.mxu1 %v199_v2  ;;  %247 = vmatpush.msra.mxu2 %v162_v3  ;;  %v229_v51 = vperm.slane %v226_v50, 1  ;;  %v228_v56 = vperm.slane %v226_v50, 0  ;;  %v423_v63 = vld [vmem:[%s658_s6] ss:$0 sm:$0xff]  ;;  %s397_s29 = sshll.u32 %s587_s4, 4  ;;  %s398_s29 = int_to_ptr.vmem [resolvable:$true] %s397_s29 }
  0x3b   :  { %286 = vmatpush.msrb.mxu0 %v165_v1  ;;  %267 = vmatpush.msra.mxu3 %v194_v7 }
  0x3c   :  { %306 = vmatpush.msrb.mxu1 %v197_v6  ;;  %350 = vmatpush.msrb.mxu2 %v329_v11 }
  0x3d   :  { %287 = vmatpush.msrb.mxu0 %v163_v5  ;;  %370 = vmatpush.msrb.mxu3 %v345_v9 }
  0x3e   :  { %307 = vmatpush.msrb.mxu1 %v195_v8  ;;  %351 = vmatpush.msrb.mxu2 %v328_v12 }
  0x3f   :  { %371 = vmatpush.msrb.mxu3 %v344_v10 }
  0x40   :  { %352 = vmatpush.msrb.mxu2 %v327_v14 }
  0x41   :  { %372 = vmatpush.msrb.mxu3 %v343_v13 }
  0x42   :  { %353 = vmatpush.msrb.mxu2 %v326_v16 }
  0x43   :  { %373 = vmatpush.msrb.mxu3 %v342_v15 }
  0x44   :  { %354 = vmatpush.msrb.mxu2 %v325_v18 }
  0x45   :  { %374 = vmatpush.msrb.mxu3 %v341_v17 }
  0x46   :  { %355 = vmatpush.msrb.mxu2 %v324_v20 }
  0x47   :  { %375 = vmatpush.msrb.mxu3 %v340_v19 }
  0x48   :  { %356 = vmatpush.msrb.mxu2 %v323_v22 }
  0x49   :  { %376 = vmatpush.msrb.mxu3 %v339_v21 }
  0x4a   :  { %357 = vmatpush.msrb.mxu2 %v322_v24 }
  0x4b   :  { %377 = vmatpush.msrb.mxu3 %v338_v23 }
  0x4c   :  { %358 = vmatpush.msrb.mxu2 %v321_v26 }
  0x4d   :  { %378 = vmatpush.msrb.mxu3 %v337_v25 }
  0x4e   :  { %359 = vmatpush.msrb.mxu2 %v320_v39 }
  0x4f   :  { %379 = vmatpush.msrb.mxu3 %v336_v27 }
  0x50   :  { %360 = vmatpush.msrb.mxu2 %v319_v41 }
  0x51   :  { %380 = vmatpush.msrb.mxu3 %v335_v28 }
  0x52   :  { %361 = vmatpush.msrb.mxu2 %v318_v43 }
  0x53   :  { %381 = vmatpush.msrb.mxu3 %v334_v30 }
  0x54   :  { %362 = vmatpush.msrb.mxu2 %v317_v45 }
  0x55   :  { %382 = vmatpush.msrb.mxu3 %v333_v40 }
  0x56   :  { %363 = vmatpush.msrb.mxu2 %v316_v47 }
  0x57   :  { %383 = vmatpush.msrb.mxu3 %v332_v42 }
  0x58   :  { %364 = vmatpush.msrb.mxu2 %v315_v48 }
  0x59   :  { %384 = vmatpush.msrb.mxu3 %v331_v44 }
  0x5a   :  { %365 = vmatpush.msrb.mxu2 %v314_v49 }
  0x5b   :  { %385 = vmatpush.msrb.mxu3 %v330_v46 }
  0x9b   :  { %v137_v33 = vpop.f32.mrf.mxu0 }
  0x9c   :  { %v157_v34 = vpop.f32.mrf.mxu1  ;;  %v138_v35 = vadd.f32 %v137_v33, %v112_v31 }
  0x9d   :  { %v158_v36 = vadd.f32 %v157_v34, %v113_v32 }
  0x9e   :  { %v160_v37 = vmax.f32 %v138_v35, 0.0 }
  0x9f   :  { %v161_v38 = vmax.f32 %v158_v36, 0.0 }
  0xa0   :  { %248 = vmatmul.f32.vlgmr.msra.gmra.mxu2 %v160_v37  ;;  %288 = vmatmul.f32.vlgmr.msrb.gmra.mxu0 %v160_v37 }
  0xa1   :  { %268 = vmatmul.f32.vlgmr.msra.gmra.mxu3 %v161_v38  ;;  %308 = vmatmul.f32.vlgmr.msrb.gmra.mxu1 %v161_v38 }
 0x11d   :  { %v289_v52 = vpop.f32.mrf.mxu0 }
 0x11e   :  { %v290_v53 = vadd.f32 %v289_v52, %v229_v51  ;;  %v309_v54 = vpop.f32.mrf.mxu1 }
 0x120   :  { %v310_v55 = vadd.f32 %v309_v54, %v290_v53 }
 0x122   :  { %v313_v57 = vmax.f32 %v310_v55, 0.0 }
 0x123   :  { %v249_v58 = vpop.f32.mrf.mxu2 }
 0x124   :  { %v250_v59 = vadd.f32 %v249_v58, %v228_v56  ;;  %386 = vmatmul.f32.vlgmr.msrb.gmra.mxu3 %v313_v57  ;;  %v269_v60 = vpop.f32.mrf.mxu3 }
 0x126   :  { %v270_v61 = vadd.f32 %v269_v60, %v250_v59 }
 0x128   :  { %v312_v62 = vmax.f32 %v270_v61, 0.0 }
 0x12a   :  { %366 = vmatmul.f32.vlgmr.msrb.gmra.mxu2 %v312_v62 }
 0x1a7   :  { %v387_v2 = vpop.f32.mrf.mxu3 }
 0x1ad   :  { %v367_v0 = vpop.f32.mrf.mxu2 }
 0x1ae   :  { %v368_v1 = vadd.f32 %v423_v63, %v367_v0 }
 0x1b0   :  { %v388_v3 = vadd.f32 %v387_v2, %v368_v1 }
 0x1b2   :  { %424 = vtanh.f32 %v388_v3 }
 0x1b8   :  { %v425_v4 = vpop.eup %424 }
 0x1b9   :  { %391 = vst [vmem:[#allocation11] sm:$0xff] %v425_v4 }
 0x1ba   :  { %402 = dma.vmem_to_hbm [thread:$0]  %s398_s29, 128, %s400_s9, [#allocation4]  }
 0x1bb   :  { %576 = dma.done.wait [#allocation4], 128  }
 0x1bc   :  { %577 = vsyncadd [#allocation4], 4294967168 }
 0x1bd   :  { %407 = vsyncpa [#allocation3], 1 }
 0x1be   :  { %408 = vsyncpa [#allocation6], 1 }
 0x1bf   :  { %409 = vsyncpa [#allocation9], 1 }
 0x1c0   :  { %410 = vsyncpa [#allocation4], 1 }

</bundles_post_ra>
